<compile_context>
chip_gen: v6e
topology: v6e:2x2x1
jax: 0.10.0
libtpu: 0.0.40
codegen_flags: <defaults>
</compile_context>

<pallas_src>
import jax
import jax.numpy as jnp
from jax.experimental import pallas as pl
from jax.experimental.pallas import tpu as pltpu


def _final_layer_kernel(shift_ref, scale1_ref, x_ref, w_ref, b_ref, o_ref):
    """One (t_tile, H) token tile of one batch element.

    shift_ref  : (1, H)        per-batch adaLN shift (f32)
    scale1_ref : (1, H)        per-batch (1 + scale)  (f32)
    x_ref      : (t_tile, H)   token tile
    w_ref      : (H, out_pad)  final projection weight, transposed + zero-padded
    b_ref      : (1, out_pad)  final projection bias, zero-padded
    o_ref      : (t_tile, out_pad)
    """
    # ---- LayerNorm (no affine, eps=1e-6) over the hidden dim, in f32.
    x = x_ref[...].astype(jnp.float32)
    mean = jnp.mean(x, axis=-1, keepdims=True)
    xc = x - mean
    var = jnp.mean(xc * xc, axis=-1, keepdims=True)
    xn = xc * jax.lax.rsqrt(var + 1e-6)

    # ---- modulate: xn * (1 + scale) + shift  (shift/scale precomputed per batch).
    mod = xn * scale1_ref[...] + shift_ref[...]

    # ---- final linear on the MXU; out_pad is a multiple of 128 -> lane-dense.
    out = jnp.dot(mod.astype(w_ref.dtype), w_ref[...],
                  preferred_element_type=jnp.float32)
    out = out + b_ref[...].astype(jnp.float32)
    o_ref[...] = out.astype(o_ref.dtype)


def final_layer_forward(x, c, w_ada, b_ada, w_lin, b_lin, *, t_tile=None):
    """FinalLayer_3D forward.

    x:     (N, T, H)          tokens
    c:     (N, H)             conditioning
    w_ada: (2H, H), b_ada: (2H,)        PyTorch layout of adaLN_modulation[1]
    w_lin: (out_dim, H), b_lin: (out_dim,)  PyTorch layout of self.linear
    Returns (N, T, out_dim).
    """
    N, T, H = x.shape
    out_dim = w_lin.shape[0]

    # ---- adaLN branch hoisted to XLA (cheap; keeps W_ada out of VMEM and
    #      avoids an M=1 MXU matmul inside the kernel).
    c32 = c.astype(jnp.float32)
    silu = c32 * jax.nn.sigmoid(c32)
    ada = silu @ w_ada.T.astype(jnp.float32) + b_ada.astype(jnp.float32)   # (N, 2H)
    shift = ada[:, :H].reshape(N, 1, H)                                    # (N,1,H) f32
    scale1 = (1.0 + ada[:, H:]).reshape(N, 1, H)                           # (N,1,H) f32

    # ---- pad the projection so the stored last dim is lane-dense (>=128).
    out_pad = max(128, pl.cdiv(out_dim, 128) * 128)
    w_lin_t = jnp.zeros((H, out_pad), dtype=w_lin.dtype).at[:, :out_dim].set(w_lin.T)
    b_lin_p = jnp.zeros((1, out_pad), dtype=b_lin.dtype).at[0, :out_dim].set(b_lin)

    # ---- token tiling: many pipeline steps + a second parallel grid axis.
    if t_tile is None:
        t_tile = next((cand for cand in (512, 256, 128) if T % cand == 0), T)
    assert T % t_tile == 0, "t_tile must divide T"
    grid = (N, T // t_tile)

    grid_spec = pltpu.PrefetchScalarGridSpec(
        num_scalar_prefetch=0,
        grid=grid,
        in_specs=[
            pl.BlockSpec((pl.Squeezed(), 1, H), lambda b, t: (b, 0, 0)),       # shift
            pl.BlockSpec((pl.Squeezed(), 1, H), lambda b, t: (b, 0, 0)),       # 1+scale
            pl.BlockSpec((pl.Squeezed(), t_tile, H), lambda b, t: (b, t, 0)),  # x tile
            pl.BlockSpec((H, out_pad), lambda b, t: (0, 0)),                   # W_lin^T (padded)
            pl.BlockSpec((1, out_pad), lambda b, t: (0, 0)),                   # b_lin (padded)
        ],
        out_specs=pl.BlockSpec((pl.Squeezed(), t_tile, out_pad),
                               lambda b, t: (b, t, 0)),
    )

    out_padded = pl.pallas_call(
        _final_layer_kernel,
        out_shape=jax.ShapeDtypeStruct((N, T, out_pad), x.dtype),
        grid_spec=grid_spec,
        compiler_params=pltpu.CompilerParams(
            dimension_semantics=("parallel", "parallel")),
    )(shift, scale1, x, w_lin_t, b_lin_p)

    # Strip the lane padding back off.
    return out_padded[..., :out_dim]


def reference_forward(x, c, w_ada, b_ada, w_lin, b_lin):
    """Pure-JAX reference mirroring the PyTorch module."""
    silu = c * jax.nn.sigmoid(c)
    ada = silu @ w_ada.T + b_ada
    H = x.shape[-1]
    shift, scale = ada[:, :H], ada[:, H:]
    mean = jnp.mean(x, axis=-1, keepdims=True)
    var = jnp.mean((x - mean) ** 2, axis=-1, keepdims=True)
    xn = (x - mean) / jnp.sqrt(var + 1e-6)
    mod = xn * (1.0 + scale[:, None, :]) + shift[:, None, :]
    return mod @ w_lin.T + b_lin


if __name__ == "__main__":
    # Small shapes consistent with FinalLayer_3D:
    #   hidden_size=32, patch_size=(2,2,2), out_channels=4 -> out_dim = 8*4 = 32
    N, T = 2, 8
    hidden_size = 32
    patch_size = (2, 2, 2)
    out_channels = 4
    out_dim = patch_size[0] * patch_size[1] * patch_size[2] * out_channels  # 32

    key = jax.random.PRNGKey(0)
    k_x, k_c, k_wa, k_ba, k_wl, k_bl = jax.random.split(key, 6)

    x = jax.random.normal(k_x, (N, T, hidden_size), dtype=jnp.float32)
    c = jax.random.normal(k_c, (N, hidden_size), dtype=jnp.float32)

    # PyTorch-layout parameters:
    w_ada = jax.random.normal(k_wa, (2 * hidden_size, hidden_size), dtype=jnp.float32) * 0.05
    b_ada = jax.random.normal(k_ba, (2 * hidden_size,), dtype=jnp.float32) * 0.05
    w_lin = jax.random.normal(k_wl, (out_dim, hidden_size), dtype=jnp.float32) * 0.05
    b_lin = jax.random.normal(k_bl, (out_dim,), dtype=jnp.float32) * 0.05

    out = final_layer_forward(x, c, w_ada, b_ada, w_lin, b_lin)
    out = jax.block_until_ready(out)

    ref = reference_forward(x, c, w_ada, b_ada, w_lin, b_lin)
    assert out.shape == (N, T, out_dim)
    assert jnp.allclose(out, ref, atol=1e-4, rtol=1e-4), "mismatch vs JAX reference"

    print("KERNEL_OK")
</pallas_src>

<mosaic_0001>
module attributes {stable_mosaic.version = 11 : i64} {
  func.func @_final_layer_kernel(%arg0: i32, %arg1: i32, %arg2: memref<1x1x32xf32, #tpu.memory_space<vmem>>, %arg3: memref<1x1x32xf32, #tpu.memory_space<vmem>>, %arg4: memref<1x8x32xf32, #tpu.memory_space<vmem>>, %arg5: memref<32x128xf32, #tpu.memory_space<vmem>>, %arg6: memref<1x128xf32, #tpu.memory_space<vmem>>, %arg7: memref<1x8x128xf32, #tpu.memory_space<vmem>>) attributes {dimension_semantics = [#tpu.dimension_semantics<parallel>, #tpu.dimension_semantics<parallel>], iteration_bounds = array<i64: 2, 1>, scalar_prefetch = 0 : i64, scratch_operands = 0 : i64, tpu.core_type = #tpu.core_type<tc>, window_params = [{transform_indices = @transform_0, window_bounds = array<i64: 1, 1, 32>}, {transform_indices = @transform_1, window_bounds = array<i64: 1, 1, 32>}, {transform_indices = @transform_2, window_bounds = array<i64: 1, 8, 32>}, {pipeline_mode = #tpu.pipeline_mode<synchronous>, transform_indices = @transform_3, window_bounds = array<i64: 32, 128>}, {pipeline_mode = #tpu.pipeline_mode<synchronous>, transform_indices = @transform_4, window_bounds = array<i64: 1, 128>}, {transform_indices = @transform_5, window_bounds = array<i64: 1, 8, 128>}]} {
    %c0 = arith.constant 0 : index
    %c0_0 = arith.constant 0 : index
    %c0_1 = arith.constant 0 : index
    %0 = vector.load %arg4[%c0, %c0_0, %c0_1] : memref<1x8x32xf32, #tpu.memory_space<vmem>>, vector<1x8x32xf32>
    %1 = vector.shape_cast %0 : vector<1x8x32xf32> to vector<8x32xf32>
    %cst = arith.constant dense<0.000000e+00> : vector<8xf32>
    %2 = vector.multi_reduction <add>, %1, %cst [1] : vector<8x32xf32> to vector<8xf32>
    %3 = vector.shape_cast %2 : vector<8xf32> to vector<8x1xf32>
    %cst_2 = arith.constant 3.200000e+01 : f32
    %4 = vector.broadcast %cst_2 : f32 to vector<8x1xf32>
    %5 = arith.divf %3, %4 : vector<8x1xf32>
    %6 = vector.broadcast %5 : vector<8x1xf32> to vector<8x32xf32>
    %7 = arith.subf %1, %6 : vector<8x32xf32>
    %8 = arith.mulf %7, %7 : vector<8x32xf32>
    %cst_3 = arith.constant dense<0.000000e+00> : vector<8xf32>
    %9 = vector.multi_reduction <add>, %8, %cst_3 [1] : vector<8x32xf32> to vector<8xf32>
    %10 = vector.shape_cast %9 : vector<8xf32> to vector<8x1xf32>
    %cst_4 = arith.constant 3.200000e+01 : f32
    %11 = vector.broadcast %cst_4 : f32 to vector<8x1xf32>
    %12 = arith.divf %10, %11 : vector<8x1xf32>
    %cst_5 = arith.constant 9.99999997E-7 : f32
    %13 = vector.broadcast %cst_5 : f32 to vector<8x1xf32>
    %14 = arith.addf %12, %13 : vector<8x1xf32>
    %15 = math.rsqrt %14 : vector<8x1xf32>
    %16 = vector.broadcast %15 : vector<8x1xf32> to vector<8x32xf32>
    %17 = arith.mulf %7, %16 : vector<8x32xf32>
    %c0_6 = arith.constant 0 : index
    %c0_7 = arith.constant 0 : index
    %c0_8 = arith.constant 0 : index
    %18 = vector.load %arg3[%c0_6, %c0_7, %c0_8] : memref<1x1x32xf32, #tpu.memory_space<vmem>>, vector<1x1x32xf32>
    %19 = vector.shape_cast %18 : vector<1x1x32xf32> to vector<1x32xf32>
    %20 = vector.broadcast %19 : vector<1x32xf32> to vector<8x32xf32>
    %21 = arith.mulf %17, %20 : vector<8x32xf32>
    %c0_9 = arith.constant 0 : index
    %c0_10 = arith.constant 0 : index
    %c0_11 = arith.constant 0 : index
    %22 = vector.load %arg2[%c0_9, %c0_10, %c0_11] : memref<1x1x32xf32, #tpu.memory_space<vmem>>, vector<1x1x32xf32>
    %23 = vector.shape_cast %22 : vector<1x1x32xf32> to vector<1x32xf32>
    %24 = vector.broadcast %23 : vector<1x32xf32> to vector<8x32xf32>
    %25 = arith.addf %21, %24 : vector<8x32xf32>
    %c0_12 = arith.constant 0 : index
    %c0_13 = arith.constant 0 : index
    %26 = vector.load %arg5[%c0_12, %c0_13] : memref<32x128xf32, #tpu.memory_space<vmem>>, vector<32x128xf32>
    %cst_14 = arith.constant dense<0.000000e+00> : vector<8x128xf32>
    %27 = tpu.matmul %25, %26, %cst_14 {dimension_numbers = #tpu.dot_dimension_numbers<[1], [0], [0], [1], [0, 0, 1, 1], [], []>} : vector<8x32xf32>, vector<32x128xf32>, vector<8x128xf32> -> vector<8x128xf32>
    %c0_15 = arith.constant 0 : index
    %c0_16 = arith.constant 0 : index
    %28 = vector.load %arg6[%c0_15, %c0_16] : memref<1x128xf32, #tpu.memory_space<vmem>>, vector<1x128xf32>
    %29 = vector.broadcast %28 : vector<1x128xf32> to vector<8x128xf32>
    %30 = arith.addf %27, %29 : vector<8x128xf32>
    %c0_17 = arith.constant 0 : index
    %c0_18 = arith.constant 0 : index
    %c0_19 = arith.constant 0 : index
    %31 = vector.load %arg7[%c0_17, %c0_18, %c0_19] : memref<1x8x128xf32, #tpu.memory_space<vmem>>, vector<1x8x128xf32>
    %32 = vector.shape_cast %31 : vector<1x8x128xf32> to vector<8x128xf32>
    %33 = vector.shape_cast %30 : vector<8x128xf32> to vector<1x8x128xf32>
    tpu.vector_store %arg7[%c0_17, %c0_18, %c0_19], %33 {strides = array<i32>} : memref<1x8x128xf32, #tpu.memory_space<vmem>>, vector<1x8x128xf32>,
    return
  }
  func.func @transform_0(%arg0: i32, %arg1: i32) -> (i32, i32, i32) {
    %c0_i32 = arith.constant 0 : i32
    %c0_i32_0 = arith.constant 0 : i32
    %c0_i32_1 = arith.constant 0 : i32
    return %arg0, %c0_i32, %c0_i32_0 : i32, i32, i32
  }
  func.func @transform_1(%arg0: i32, %arg1: i32) -> (i32, i32, i32) {
    %c0_i32 = arith.constant 0 : i32
    %c0_i32_0 = arith.constant 0 : i32
    %c0_i32_1 = arith.constant 0 : i32
    return %arg0, %c0_i32, %c0_i32_0 : i32, i32, i32
  }
  func.func @transform_2(%arg0: i32, %arg1: i32) -> (i32, i32, i32) {
    %c0_i32 = arith.constant 0 : i32
    %c0_i32_0 = arith.constant 0 : i32
    return %arg0, %arg1, %c0_i32 : i32, i32, i32
  }
  func.func @transform_3(%arg0: i32, %arg1: i32) -> (i32, i32) {
    %c0_i32 = arith.constant 0 : i32
    %c0_i32_0 = arith.constant 0 : i32
    %c0_i32_1 = arith.constant 0 : i32
    return %c0_i32, %c0_i32_0 : i32, i32
  }
  func.func @transform_4(%arg0: i32, %arg1: i32) -> (i32, i32) {
    %c0_i32 = arith.constant 0 : i32
    %c0_i32_0 = arith.constant 0 : i32
    %c0_i32_1 = arith.constant 0 : i32
    return %c0_i32, %c0_i32_0 : i32, i32
  }
  func.func @transform_5(%arg0: i32, %arg1: i32) -> (i32, i32, i32) {
    %c0_i32 = arith.constant 0 : i32
    %c0_i32_0 = arith.constant 0 : i32
    return %arg0, %arg1, %c0_i32 : i32, i32, i32
  }
}

</mosaic_0001>

<bundles_post_ra>
// kernel: tpu_custom_call.1
= control target key start
LH: loop header
LB: loop body
LE: loop exit
PB: predicated region body
PF: predicated region fallthrough
CT: control target
= control target key end

     0   :  { %s1195_s0 = inlined_call_operand.hbm [shape: f32[2,1,32], index: 0, kind: input, shape index: {}]   ;;  %s1196_s1 = inlined_call_operand.hbm [shape: f32[2,1,32], index: 1, kind: input, shape index: {}]   ;;  %s1197_s2 = inlined_call_operand.hbm [shape: f32[2,8,32], index: 2, kind: input, shape index: {}]   ;;  %s1198_s3 = inlined_call_operand.hbm [shape: f32[32,128], index: 3, kind: input, shape index: {}]   ;;  %s1199_s4 = inlined_call_operand.vmem [shape: f32[1,128], index: 4, kind: input, shape index: {}]   ;;  %s1200_s5 = inlined_call_operand.hbm [shape: f32[2,8,128], index: 5, kind: output, shape index: {}]  }
   0x1   :  { %1204 = sst [smem:[#allocation17_spill]] %s1195_s0 }
   0x2   :  { %1205 = sst [smem:[#allocation18_spill]] %s1196_s1 }
   0x3   :  { %1206 = sst [smem:[#allocation19_spill]] %s1198_s3 }
   0x4   :  { %10 = vsyncpa [#allocation3], 0 }
   0x5   :  { %12 = vsyncpa [#allocation3 + $0x1], 0 }
   0x6   :  { %13 = vsyncpa [#allocation6], 0 }
   0x7   :  { %15 = vsyncpa [#allocation6 + $0x1], 0 }
   0x8   :  { %16 = vsyncpa [#allocation9], 0 }
   0x9   :  { %17 = vsyncpa [#allocation4], 0 }
   0xa   :  { %19 = vsyncpa [#allocation4 + $0x1], 0  ;;  %s961_s18 = smov 0   ;;  %s963_s19 = smov 0  }
   0xb   :  { %s965_s20 = smov 0   ;;  %s967_s21 = smov 0  }
   0xc   :  { %s969_s22 = smov 0   ;;  %s971_s23 = smov 0  }
   0xd LB: > { %s37_s24 = sadd.s32 1, %s916_s22  ;;  %s44_s25 = sadd.s32 1, %s908_s20  ;;  %s920_s23 = sphi %s971_s23, %s25_s23   ;;  %s916_s22 = sphi %s969_s22, %s1230_s22   ;;  %s912_s21 = sphi %s967_s21, %s1229_s21   ;;  %s908_s20 = sphi %s965_s20, %s1228_s20   ;;  %s904_s19 = sphi %s963_s19, %s1227_s19   ;;  %s900_s18 = sphi %s961_s18, %s1226_s18  }
   0xe   : > { %p39_p0 = scmp.ge.s32.totalorder %s37_s24, 2  ;;  %p51_p1 = scmp.ne.s32.totalorder %s908_s20, %s904_s19 }
   0xf   : > { %p52_p2 = scmp.eq.s32.totalorder %s920_s23, 0  ;;  %p664_p5 = scmp.lt.s32.totalorder %s920_s23, 2 }
  0x10   : > { %s1232_s24 = smov (%p39_p0, %s37_s24), 0  ;;  %s1006_s27 = sand.u32 1, %s908_s20  }
  0x11   : > { %1207 = sst [smem:[#allocation15_spill]] %s1232_s24  ;;  %p53_p4 = por %p52_p2, %p51_p1 }
  0x12   : > { %s41_s26 = ssub.s32 %s916_s22, %s1232_s24  ;;  %s601_s28 = sshll.u32 %s916_s22, 4 }
  0x13   : > { %p42_p6 = scmp.eq.s32.totalorder %s41_s26, 0  ;;  %p1009_p7 = pnand %p664_p5, %p53_p4 }
  0x14   : > { %s238_s30 = sand.u32 1, %s920_s23   ;;  %s1210_s1 = sld [smem:[#allocation18_spill]] }
  0x15   : > { %s1015_s6 = scalar_select %p42_p6, %s908_s20, %s44_s25  }
  0x16   : > { %s241_s10 = scalar_lea.vmem [#allocation5], %s1006_s27  ;;  %s1023_s12 = scalar_lea.sflag [#allocation6], %s238_s30 }
  0x17   : > { %1209 = sst [smem:[#allocation16_spill]] %s1015_s6  ;;  %s248_s11 = sshll.u32 %s241_s10, 4  ;;  %s249_s11 = int_to_ptr.vmem [resolvable:$true] %s248_s11 }
  0x18   : > { %p1201_p8 = pneg %p1009_p7  ;;  %s735_s13 = scalar_lea.vmem %s249_s11, 16 }
  0x19   : > { %p736_p9 = scmp.ne.s32.totalorder %s249_s11, %s735_s13  ;;  %s922_s14 = smov [#allocation5]  }
  0x1a   : > { %s246_s9 = scalar_lea.hbm %s1210_s1, %s601_s28  ;;  %s740_s15 = sshll.u32 %s922_s14, 4  ;;  %s741_s15 = int_to_ptr.vmem [resolvable:$false] %s740_s15 }
  0x1b   : > { %p738_p10 = pnand %p736_p9, %p1201_p8  ;;  %s742_s16 = scalar_lea.vmem %s741_s15, 32 }
  0x1c   : > { %p743_p12 = scmp.lt.s32.totalorder %s249_s11, %s741_s15  ;;  %p744_p13 = scmp.lt.s32.totalorder %s742_s16, %s735_s13 }
  0x1d   : > { %p739_p11 = pneg %p738_p10 }
  0x1e   : > { %p745_p0 = por %p744_p13, %p743_p12 }
  0x20   : > { %p746_p2 = pnand %p745_p0, %p739_p11 }
  0x22   : > { %749 = shalt.err (!%p746_p2)
}
  0x23   : > { %655 = dma.hbm_to_vmem [thread:$0]  (!%p1009_p7), %s246_s9, 16, %s249_s11, %s1023_s12  }
  0x24   : > { %s1034_s17 = sadd.s32 4294967295, %s920_s23   ;;  %s597_s25 = sadd.s32 4294967294, %s920_s23  }
  0x25   : > { %p57_p4 = scmp.ne.s32.totalorder %s904_s19, %s900_s18  ;;  %p58_p5 = scmp.eq.s32.totalorder %s1034_s17, 0 }
  0x26   : > { %p179_p6 = scmp.eq.s32.totalorder %s1034_s17, 1  ;;  %p185_p9 = scmp.eq.s32.totalorder %s597_s25, 1 }
  0x27   : > { %p1043_p10 = por %p58_p5, %p57_p4  ;;  %p598_p11 = scmp.ge.s32.totalorder %s920_s23, 1 }
  0x28   : > { %p1051_p12 = por %p179_p6, %p51_p1  ;;  %p1055_p13 = por %p185_p9, %p57_p4 }
  0x29   : > { %p192_p0 = scmp.lt.s32.totalorder %s920_s23, 3  ;;  %s923_s9 = smov [#allocation8]  }
  0x2a   : > { %s1212_s30 = scalar_select %p1051_p12, 1, 0 }
  0x2b   : > { %s1213_s7 = scalar_select %p1055_p13, 1, 0 }
  0x2c   : > { %p1060_p2 = pnand %p598_p11, %p192_p0  ;;  %s204_s10 = sshll.u32 %s923_s9, 4  ;;  %s205_s10 = int_to_ptr.vmem [resolvable:$true] %s204_s10 }
  0x2d   : > { %s1215_s0 = sld [smem:[#allocation17_spill]]  ;;  %s224_s16 = scalar_lea.vmem [#allocation2], %s1006_s27 }
  0x2e   : > { %p645_p3 = pneg %p1060_p2  ;;  %s231_s25 = sshll.u32 %s224_s16, 4  ;;  %s1080_s25 = int_to_ptr.vmem [resolvable:$true] %s231_s25 }
  0x2f   : > { %s761_s1 = scalar_lea.vmem %s205_s10, 512  ;;  %p769_p0 = scmp.lt.s32.totalorder %s205_s10, %s205_s10 }
  0x30   : > { %p1075_p1 = pnand %p645_p3, %p58_p5  ;;  %p762_p6 = scmp.ne.s32.totalorder %s205_s10, %s761_s1 }
  0x31   : > { %p770_p8 = scmp.lt.s32.totalorder %s761_s1, %s761_s1 }
  0x32   : > { %p752_p4 = pneg %p1075_p1 }
  0x33   : > { %s1071_s14 = scalar_lea.hbm %s1215_s0, %s601_s28  ;;  %p771_p13 = por %p770_p8, %p769_p0 }
  0x34   : > { %p764_p9 = pnand %p762_p6, %p752_p4 }
  0x36   : > { %p765_p11 = pneg %p764_p9 }
  0x38   : > { %p772_p12 = pnand %p771_p13, %p765_p11 }
  0x3a   : > { %775 = shalt.err (!%p772_p12)
}
  0x3b   : > { %s924_s28 = smov 128   ;;  %s925_s11 = smov 8  }
  0x3c   : > { %s1217_s3 = sld [smem:[#allocation19_spill]]  ;;  %s222_s9 = scalar_lea.sflag [#allocation3], %s1006_s27 }
  0x3d   : > { %s789_s0 = scalar_lea.vmem %s1080_s25, 16  ;;  %p1218_p8 = pneg %p1009_p7 }
  0x3e   : > { %p790_p3 = scmp.ne.s32.totalorder %s1080_s25, %s789_s0  ;;  %s926_s1 = smov [#allocation2]  }
  0x3f   : > { %s794_s24 = sshll.u32 %s926_s1, 4  ;;  %s795_s24 = int_to_ptr.vmem [resolvable:$false] %s794_s24 }
  0x40   : > { %p792_p13 = pnand %p790_p3, %p1218_p8  ;;  %s796_s6 = scalar_lea.vmem %s795_s24, 32 }
  0x41   : > { %p797_p4 = scmp.lt.s32.totalorder %s1080_s25, %s795_s24  ;;  %p798_p6 = scmp.lt.s32.totalorder %s796_s6, %s789_s0 }
  0x42   : > { %648 = dma.hbm_to_vmem [thread:$0]  (!%p1075_p1), %s1217_s3, 512, %s205_s10, [#allocation9], %s924_s28, %s924_s28, %s925_s11  }
  0x43   : > { %p793_p12 = pneg %p792_p13  ;;  %p799_p9 = por %p798_p6, %p797_p4 }
  0x45   : > { %p800_p11 = pnand %p799_p9, %p793_p12 }
  0x47   : > { %803 = shalt.err (!%p800_p11)
}
  0x48   : > { %652 = dma.hbm_to_vmem [thread:$0]  (!%p1009_p7), %s1071_s14, 16, %s1080_s25, %s222_s9  }
  0x49   : > { %s604_s10 = sshll.u32 %s916_s22, 7  ;;  %s1219_s15 = sshll.u32 %s1006_s27, 3 }
  0x4a   : > { %s259_s28 = scalar_lea.vmem [#allocation7], %s1219_s15  ;;  %s265_s24 = scalar_lea.hbm %s1197_s2, %s604_s10 }
  0x4b   : > { %s267_s11 = sshll.u32 %s259_s28, 4  ;;  %p1220_p0 = pmov %p1218_p8  ;;  %s268_s11 = int_to_ptr.vmem [resolvable:$true] %s267_s11 }
  0x4c   : > { %s817_s0 = scalar_lea.vmem %s268_s11, 128  ;;  %s927_s6 = smov [#allocation7]  }
  0x4d   : > { %p818_p1 = scmp.ne.s32.totalorder %s268_s11, %s817_s0  ;;  %s822_s1 = sshll.u32 %s927_s6, 4  ;;  %s823_s1 = int_to_ptr.vmem [resolvable:$false] %s822_s1 }
  0x4e   : > { %s824_s3 = scalar_lea.vmem %s823_s1, 256  ;;  %p825_p13 = scmp.lt.s32.totalorder %s268_s11, %s823_s1 }
  0x4f   : > { %p820_p3 = pnand %p818_p1, %p1220_p0  ;;  %p826_p12 = scmp.lt.s32.totalorder %s824_s3, %s817_s0 }
  0x51   : > { %p821_p8 = pneg %p820_p3  ;;  %p827_p4 = por %p826_p12, %p825_p13 }
  0x53   : > { %p828_p6 = pnand %p827_p4, %p821_p8 }
  0x55   : > { %831 = shalt.err (!%p828_p6)
}
  0x56   : > { %658 = dma.hbm_to_vmem [thread:$0]  (!%p1009_p7), %s265_s24, 128, %s268_s11, %s1023_s12  }
  0x57   : > { %276 = sbr.rel (%p1060_p2) target bundleno = 616 (0x268), region = 40  ;;  %s1116_s27 = sand.u32 (!%p1060_p2), 1, %s904_s19  }
  0x58   : > { %s279_s14 = scalar_lea.sflag (!%p1060_p2), [#allocation3], %s1116_s27  ;;  %s281_s25 = scalar_lea.vmem (!%p1060_p2), [#allocation2], %s1116_s27 }
  0x5c   : > { %883 = dma.done.wait (%p1043_p10), %s279_s14, 16  }
  0x5d   : > { %885 = vsyncadd (%p1043_p10), %s279_s14, 4294967280  ;;  %s286_s3 = sand.u32 1, %s1034_s17   ;;  %s289_s12 = scalar_lea.vmem [#allocation5], %s1116_s27 }
  0x5e   : > { %s287_s29 = scalar_lea.sflag [#allocation6], %s286_s3 }
  0x5f   : > { %887 = dma.done.wait (%p1043_p10), %s287_s29, 144  }
  0x60   : > { %889 = vsyncadd (%p1043_p10), %s287_s29, 4294967152  ;;  %s606_s8 = sshll.u32 %s1116_s27, 3 }
  0x61   : > { %s298_s9 = scalar_lea.vmem [#allocation7], %s606_s8 }
  0x62   : > { %891 = dma.done.wait (%p58_p5), [#allocation9], 512  }
  0x63   : > { %893 = vsyncadd (%p58_p5), [#allocation9], 4294966784  ;;  %vm338_vm0 = vcmask 261120   ;;  %v337_v0 = vld [vmem:[%s298_s9] sm:$0xff]  ;;  %v928_v8 = vmov 0.0   ;;  %vm929_vm1 = vmmov 0  }
  0x64   : > { %v339_v1 = vsel %vm338_vm0, %v337_v0, 0.0  ;;  %v372_v7 = vld [vmem:[#allocation8 + $0x18] sm:$0xff]  ;;  %622 = vmatprep.subr.mxu0 %v928_v8  ;;  %v371_v9 = vld [vmem:[#allocation8 + $0x10] sm:$0xff]  ;;  %630 = vmatprep.mubr.msk.f32.mxu0 %vm929_vm1, %v928_v8  ;;  %v370_v10 = vld [vmem:[#allocation8 + $0x8] sm:$0xff]  ;;  %s614_s10 = sshll.u32 %s912_s21, 7  ;;  %s336_s15 = scalar_lea.vmem [#allocation10], %s606_s8 }
  0x65   : > { %340 = vadd.xlane.f32.xlu0 %v339_v1  ;;  %623 = vmatpush3.msra.mxu0 %v372_v7  ;;  %v369_v11 = vld [vmem:[#allocation8] sm:$0xff]  ;;  %v609_v16 = vld [vmem:[%s289_s12] ss:$0 sm:$0xff]  ;;  %s469_s28 = sshll.u32 %s336_s15, 4  ;;  %s1153_s16 = scalar_lea.hbm %s1200_s5, %s614_s10  ;;  %s470_s28 = int_to_ptr.vmem [resolvable:$true] %s469_s28 }
  0x66   : > { %624 = vmatprep.subr.mxu0 %v928_v8  ;;  %v610_v18 = vld [vmem:[%s281_s25] ss:$0 sm:$0xff]  ;;  %s455_s24 = scalar_lea.sflag [#allocation4], %s1116_s27  ;;  %s832_s0 = scalar_lea.vmem %s470_s28, 128 }
  0x67   : > { %625 = vmatpush3.msra.mxu0 %v371_v9  ;;  %v611_v21 = vld [vmem:[%s1199_s4] ss:$0 sm:$0xff]  ;;  %p833_p7 = scmp.ne.s32.totalorder %s470_s28, %s832_s0  ;;  %p1221_p5 = scmp.ne.s32.totalorder %s1212_s30, 0 }
  0x68   : > { %626 = vmatprep.subr.mxu0 %v928_v8  ;;  %s930_s21 = smov [#allocation10]  }
  0x69   : > { %627 = vmatpush3.msra.mxu0 %v370_v10  ;;  %p834_p10 = pnand %p833_p7, %p1221_p5  ;;  %s836_s6 = sshll.u32 %s930_s21, 4  ;;  %s837_s6 = int_to_ptr.vmem [resolvable:$false] %s836_s6 }
  0x6a   : > { %628 = vmatprep.subr.mxu0 %v928_v8  ;;  %s838_s1 = scalar_lea.vmem %s837_s6, 256  ;;  %p839_p9 = scmp.lt.s32.totalorder %s470_s28, %s837_s6 }
  0x6b   : > { %629 = vmatpush3.msra.mxu0 %v369_v11  ;;  %p835_p2 = pneg %p834_p10  ;;  %p840_p11 = scmp.lt.s32.totalorder %s838_s1, %s832_s0 }
  0x6d   : > { %p841_p1 = por %p840_p11, %p839_p9 }
  0x6f   : > { %p842_p0 = pnand %p841_p1, %p835_p2 }
  0xee   : > { %v341_v2 = vpop.xlane.xlu0 %340 }
  0xef   : > { %v343_v3 = vmul.f32 0.03125, %v341_v2 }
  0xf1   : > { %v344_v4 = vsub.f32 %v337_v0, %v343_v3 }
  0xf3   : > { %v345_v5 = vmul.f32 %v344_v4, %v344_v4 }
  0xf5   : > { %v346_v6 = vsel %vm338_vm0, %v345_v5, 0.0 }
  0xf6   : > { %347 = vadd.xlane.f32.xlu0 %v346_v6 }
 0x17f   : > { %v348_v12 = vpop.xlane.xlu0 %347 }
 0x180   : > { %v349_v13 = vmul.f32 0.03125, %v348_v12 }
 0x182   : > { %v350_v14 = vadd.f32 1e-06, %v349_v13 }
 0x184   : > { %720 = vrsqrt.f32 %v350_v14 }
 0x191   : > { %v721_v15 = vpop.eup %720 }
 0x192   : > { %v352_v17 = vmul.f32 %v721_v15, %v344_v4 }
 0x194   : > { %v360_v19 = vmul.f32 %v609_v16, %v352_v17 }
 0x196   : > { %v368_v20 = vadd.f32 %v610_v18, %v360_v19 }
 0x198   : > { %631 = vmatmul.mubr.msk.f32.vlgmr.msra.gmra.mxu0 %vm338_vm0, %v368_v20 }
 0x258   : > { %v449_v22 = vpop.f32.mrf.mxu0 }
 0x259   : > { %v450_v23 = vadd.f32 %v611_v21, %v449_v22 }
 0x25a   : > { %v632_v24 = vpop.f32.mrf.mxu0 }
 0x25b   : > { %453 = vst [vmem:[%s336_s15] sm:$0xff] %v450_v23 }
 0x25c   : > { %845 = shalt.err (!%p842_p0)
}
 0x25d   : > { %s846_s14 = scalar_lea.hbm %s1153_s16, 128  ;;  %s850_s3 = scalar_lea.hbm %s1200_s5, 256 }
 0x25e   : > { %p847_p3 = scmp.ne.s32.totalorder %s1153_s16, %s846_s14  ;;  %p851_p12 = scmp.lt.s32.totalorder %s1153_s16, %s1200_s5 }
 0x25f   : > { %p852_p4 = scmp.lt.s32.totalorder %s850_s3, %s846_s14 }
 0x260   : > { %p848_p8 = pnand %p847_p3, %p1221_p5 }
 0x261   : > { %p853_p6 = por %p852_p4, %p851_p12 }
 0x262   : > { %p849_p13 = pneg %p848_p8 }
 0x264   : > { %p854_p7 = pnand %p853_p6, %p849_p13 }
 0x266   : > { %857 = shalt.err (!%p854_p7)
}
 0x267   : > { %643 = dma.vmem_to_hbm [thread:$0]  (%p1221_p5), %s470_s28, 128, %s1153_s16, %s455_s24  }
 0x268 PF: > { %s481_s8 = sand.u32 1, %s900_s18   ;;  %p1222_p10 = scmp.ne.s32.totalorder %s1213_s7, 0 }
 0x269   : > { %p1223_p2 = scmp.ge.s32.totalorder %s920_s23, 2  ;;  %s482_s9 = scalar_lea.sflag [#allocation4], %s481_s8 }
 0x26b   : > { %p660_p9 = pnand %p1223_p2, %p1222_p10 }
 0x26d   : > { %p661_p11 = pneg %p660_p9 }
 0x26f   : > { %895 = dma.done.wait (%p661_p11), %s482_s9, 128  }
 0x270   : > { %897 = vsyncadd (%p661_p11), %s482_s9, 4294967168  ;;  %s25_s23 = sadd.s32 1, %s920_s23   ;;  %s1224_s30 = sld [smem:[#allocation16_spill]] }
 0x271   : > { %p22_p1 = scmp.ge.s32.totalorder %s25_s23, 4   ;;  %s1225_s17 = sld [smem:[#allocation15_spill]] }
 0x272   : > { %s1226_s18 = smov %s904_s19  ;;  %s1227_s19 = smov %s908_s20 }
 0x273   : > { %s1229_s21 = smov %s916_s22  ;;  %24 = sbr.rel (!%p22_p1) target bundleno = 13 (0xd), region = 113 }
 0x276   : > { %s1228_s20 = smov %s1224_s30 }
 0x277   : > { %s1230_s22 = smov %s1225_s17 }
 0x278   :  { %487 = vsyncpa [#allocation3], 1 }
 0x279   :  { %489 = vsyncpa [#allocation3 + $0x1], 1 }
 0x27a   :  { %490 = vsyncpa [#allocation6], 1 }
 0x27b   :  { %492 = vsyncpa [#allocation6 + $0x1], 1 }
 0x27c   :  { %493 = vsyncpa [#allocation9], 1 }
 0x27d   :  { %494 = vsyncpa [#allocation4], 1 }
 0x27e   :  { %496 = vsyncpa [#allocation4 + $0x1], 1 }

</bundles_post_ra>
